<compile_context>
chip_gen: v6e
topology: v6e:2x2x1
jax: 0.10.0
libtpu: 0.0.40
codegen_flags: <defaults>
</compile_context>

<pallas_src>
import functools

import jax
import jax.numpy as jnp
from jax.experimental import pallas as pl
from jax.experimental.pallas import tpu as pltpu


# ----------------------------- tree structure ------------------------------
class TreeNode:
    """Minimal binary-tree node mirroring what DecoderTreeNetwork expects."""

    def __init__(self, children=()):
        self.children = list(children)

    @property
    def is_preterminal(self):
        return len(self.children) == 0


def _assign_leaf_indices(tree):
    """DFS-preorder leaf indices == torch.stack order of recursive_forward."""
    order = {}

    def dfs(node):
        if node.is_preterminal:
            order[id(node)] = len(order)
        else:
            for c in node.children:
                dfs(c)

    dfs(tree)
    return order


def count_preterminals(tree):
    return len(_assign_leaf_indices(tree))


def _max_internal_width(tree):
    """Max number of internal nodes at any BFS level of the tree."""
    widest = 0
    level = [tree]
    while level:
        internals = [n for n in level if not n.is_preterminal]
        widest = max(widest, len(internals))
        level = [c for n in internals for c in n.children]
    return widest


_ACTIVATIONS = {
    "tanh": jnp.tanh,
    "sigmoid": jax.nn.sigmoid,
    "relu": lambda x: jnp.maximum(x, 0.0),
    # TODO(synk): 'prelu' needs a learnable slope parameter; not implemented.
}


# ------------------------------ Pallas kernel ------------------------------
def _decoder_tree_kernel(enc_ref, wlr_ref, blr_ref, wt_ref, mask_ref,
                         out_ref, lvl_ref, leaf_ref, *,
                         tree, h_pad, training, activation):
    act = _ACTIVATIONS[activation]
    tb = enc_ref.shape[0]
    leaf_idx = _assign_leaf_indices(tree)
    n_leaves = len(leaf_idx)

    wlr = wlr_ref[...]          # (H_pad, 2*H_pad) bf16, [left | right] halves
    blr = blr_ref[...]          # (1, 2*H_pad)     f32

    # Breadth-first, level-batched traversal.  The tree is static Python, so
    # this loop is fully unrolled at trace time, but each level issues exactly
    # ONE fused (n*TB, H_pad) @ (H_pad, 2*H_pad) matmul.  Leaf hiddens go
    # straight into the bf16 leaf scratch buffer; internal children are
    # scattered (compacted, tile-aligned) into the ping-pong level scratch
    # buffer -- no jnp.concatenate anywhere.
    if tree.is_preterminal:
        leaf_ref[0:tb, :] = enc_ref[...]
        internals = []
    else:
        internals = [tree]

    use_enc = True
    cur = 0
    while internals:
        n = len(internals)
        if use_enc:
            x = enc_ref[...]                       # (TB, H_pad)   bf16
        else:
            x = lvl_ref[cur, 0:n * tb, :]          # (n*TB, H_pad) bf16
        h = act(jnp.dot(x, wlr, preferred_element_type=jnp.float32) + blr)
        h = h.astype(leaf_ref.dtype)               # (n*TB, 2*H_pad) bf16

        nxt = 1 - cur
        next_internals = []
        for j, node in enumerate(internals):
            r0, r1 = j * tb, (j + 1) * tb
            # Mirrors zip(children, h_children.split(H, dim=1)) semantics;
            # both halves are lane-tile aligned (h_pad % 128 == 0).
            halves = (h[r0:r1, 0:h_pad], h[r0:r1, h_pad:2 * h_pad])
            for child, h_c in zip(node.children, halves):
                if child.is_preterminal:
                    li = leaf_idx[id(child)]
                    leaf_ref[li * tb:(li + 1) * tb, :] = h_c
                else:
                    k = len(next_internals)
                    lvl_ref[nxt, k * tb:(k + 1) * tb, :] = h_c
                    next_internals.append(child)
        internals = next_internals
        use_enc = False
        cur = nxt

    # One terminal matmul for ALL preterminals: (L*TB, H_pad) @ (H_pad, O_pad).
    # TODO(synk): for very large O, add a second grid axis tiling O_pad and
    # stream W_terminal from HBM instead of keeping it resident.
    logits = jnp.dot(leaf_ref[...], wt_ref[...],
                     preferred_element_type=jnp.float32)   # (L*TB, O_pad) f32

    if not training:
        logits = logits + mask_ref[...]            # -1e30 on padded lanes
        m = jnp.max(logits, axis=-1, keepdims=True)
        e = jnp.exp(logits - m)
        denom = jnp.sum(e, axis=-1, keepdims=True)
        logits = e * pl.reciprocal(denom, approx=True)

    # Single lane-dense bulk store (major-dim reshape is layout-free).
    out_ref[...] = logits.reshape(n_leaves, tb, logits.shape[-1]).astype(
        out_ref.dtype)


# --------------------------------- wrapper ----------------------------------
def _round_up(x, m):
    return ((x + m - 1) // m) * m


def _vmem_limit_bytes():
    cap = 64 * 1024 * 1024                      # conservative (v7x) fallback
    try:
        cap = int(getattr(pltpu.get_tpu_info(), "vmem_capacity_bytes", cap))
    except Exception:
        pass
    return min((cap * 3) // 4, 100 * 1024 * 1024)


def _pick_batch_tile(b_pad, per_row_bytes, fixed_bytes, budget_bytes):
    """Largest multiple-of-16 tile dividing b_pad that fits the VMEM budget."""
    best = 16
    t = 16
    while t <= min(b_pad, 2048):
        if b_pad % t == 0 and fixed_bytes + t * per_row_bytes <= budget_bytes:
            best = t
        t += 16
    # Prefer >= 2 grid steps so both v7x TensorCores get work.
    if best == b_pad and b_pad >= 32 and (b_pad // 2) % 16 == 0:
        best = b_pad // 2
    return best


def decoder_tree_forward(tree, encoding, w_terminal, w_nonterminal,
                         b_nonterminal, *, training=False, activation="tanh",
                         compute_dtype=jnp.bfloat16):
    """Runs the DecoderTreeNetwork forward pass in a single Pallas kernel."""
    B, H = encoding.shape
    O = w_terminal.shape[0]
    L = count_preterminals(tree)
    max_int_w = max(1, _max_internal_width(tree))

    H_pad = _round_up(H, 128)            # MXU contraction dim
    O_pad = _round_up(O, 128)            # lane-dense output
    B_pad = _round_up(B, 16)             # sublane-aligned bf16 row slices
    H2 = 2 * H_pad
    f32 = jnp.float32

    # -------- wrapper-side layout plumbing (free, outside the kernel) -------
    # Fused non-terminal weight: left child in columns [:H_pad], right child
    # in [H_pad:]; padded rows/cols are zero so padding never perturbs math.
    w_lr = jnp.zeros((H_pad, H2), compute_dtype)
    w_lr = w_lr.at[:H, :H].set(w_nonterminal[:H, :].T.astype(compute_dtype))
    w_lr = w_lr.at[:H, H_pad:H_pad + H].set(
        w_nonterminal[H:, :].T.astype(compute_dtype))
    b_lr = jnp.zeros((1, H2), f32)
    b_lr = b_lr.at[0, :H].set(b_nonterminal[:H].astype(f32))
    b_lr = b_lr.at[0, H_pad:H_pad + H].set(b_nonterminal[H:].astype(f32))

    wt = jnp.zeros((H_pad, O_pad), compute_dtype)
    wt = wt.at[:H, :O].set(w_terminal.T.astype(compute_dtype))

    # Additive padding mask for the eval softmax (one vadd in the kernel).
    mask = jnp.where(jnp.arange(O_pad) < O, 0.0, -1e30).astype(f32)
    mask = mask.reshape(1, O_pad)

    enc = jnp.zeros((B_pad, H_pad), compute_dtype)
    enc = enc.at[:B, :H].set(encoding.astype(compute_dtype))

    # ---------------- VMEM-budget-derived batch tile ------------------------
    bpe = jnp.dtype(compute_dtype).itemsize
    fixed = 2 * (H_pad * H2 * bpe + H_pad * O_pad * bpe + H2 * 4 + O_pad * 4)
    per_row = (
        2 * H_pad * bpe                       # encoding block (double buffered)
        + 2 * L * O_pad * 4                   # output block   (double buffered)
        + 2 * max_int_w * H_pad * bpe         # ping-pong level scratch
        + L * H_pad * bpe                     # leaf-hidden scratch
        + max_int_w * H2 * (4 + bpe)          # per-level activations (f32+bf16)
        + 3 * L * O_pad * 4                   # logits / exp / softmax temps
    )
    vmem_limit = _vmem_limit_bytes()
    TB = _pick_batch_tile(B_pad, per_row, fixed, (vmem_limit * 9) // 10)
    grid = (B_pad // TB,)

    kernel = functools.partial(
        _decoder_tree_kernel, tree=tree, h_pad=H_pad, training=training,
        activation=activation)

    # TODO(synk): mark the constant-index weight specs pipeline_mode=
    # pl.Buffered(1) to stop double-buffering resident weights once weight
    # sizes make that worthwhile (buys back VMEM on v7x's 64 MiB).
    out = pl.pallas_call(
        kernel,
        out_shape=jax.ShapeDtypeStruct((L, B_pad, O_pad), f32),
        grid_spec=pltpu.PrefetchScalarGridSpec(
            num_scalar_prefetch=0,
            grid=grid,
            in_specs=[
                pl.BlockSpec((TB, H_pad), lambda i: (i, 0)),     # encoding tile
                pl.BlockSpec((H_pad, H2), lambda i: (0, 0)),     # fused W_lr
                pl.BlockSpec((1, H2), lambda i: (0, 0)),         # fused bias
                pl.BlockSpec((H_pad, O_pad), lambda i: (0, 0)),  # W_terminal
                pl.BlockSpec((1, O_pad), lambda i: (0, 0)),      # softmax mask
            ],
            out_specs=pl.BlockSpec((L, TB, O_pad), lambda i: (0, i, 0)),
            scratch_shapes=[
                pltpu.VMEM((2, max_int_w * TB, H_pad), compute_dtype),
                pltpu.VMEM((L * TB, H_pad), compute_dtype),
            ]),
        compiler_params=pltpu.CompilerParams(
            dimension_semantics=("parallel",),
            vmem_limit_bytes=vmem_limit),
    )(enc, w_lr, b_lr, wt, mask)

    # Strip the batch / lane padding (free XLA slice outside the kernel).
    return out[:, :B, :O]


# ---------------------------- pure-JAX reference ----------------------------
def decoder_tree_reference(tree, encoding, w_terminal, w_nonterminal,
                           b_nonterminal, *, training=False,
                           activation="tanh"):
    H = encoding.shape[1]
    act = _ACTIVATIONS[activation]

    def recurse(node, hidden):
        if node.is_preterminal:
            return [hidden @ w_terminal.T]
        h_children = act(hidden @ w_nonterminal.T + b_nonterminal[None, :])
        outputs = []
        for child, h_c in zip(node.children,
                              (h_children[:, :H], h_children[:, H:])):
            outputs += recurse(child, h_c)
        return outputs

    preds = jnp.stack(recurse(tree, encoding))
    if not training:
        preds = jax.nn.softmax(preds, axis=2)
    return preds


# ----------------------------------- main -----------------------------------
if __name__ == "__main__":
    batch = 4
    hidden_size = 32
    output_size = 16

    # Static binary tree: root -> (leaf, inner); inner -> (leaf, leaf)
    #   => 3 preterminals, DFS/stack order = (left leaf, inner.left, inner.right)
    tree = TreeNode([TreeNode(), TreeNode([TreeNode(), TreeNode()])])

    key = jax.random.PRNGKey(0)
    k_enc, k_wt, k_wnt, k_bnt = jax.random.split(key, 4)

    bound = 1.0 / (hidden_size ** 0.5)
    encoding = jax.random.normal(k_enc, (batch, hidden_size), dtype=jnp.float32)
    w_terminal = jax.random.uniform(
        k_wt, (output_size, hidden_size), jnp.float32, -bound, bound)
    w_nonterminal = jax.random.uniform(
        k_wnt, (2 * hidden_size, hidden_size), jnp.float32, -bound, bound)
    b_nonterminal = jax.random.uniform(
        k_bnt, (2 * hidden_size,), jnp.float32, -bound, bound)

    out = decoder_tree_forward(
        tree, encoding, w_terminal, w_nonterminal, b_nonterminal,
        training=False)
    out = jax.block_until_ready(out)

    ref = decoder_tree_reference(
        tree, encoding, w_terminal, w_nonterminal, b_nonterminal,
        training=False)
    ref = jax.block_until_ready(ref)

    assert out.shape == (3, batch, output_size), out.shape
    # bf16 MXU inputs + approx softmax reciprocal => relaxed tolerance vs the
    # f32 reference.
    max_err = float(jnp.max(jnp.abs(out - ref)))
    assert jnp.allclose(out, ref, atol=3e-2, rtol=3e-2), max_err
    # eval-mode softmax rows should still sum to ~1
    assert jnp.allclose(jnp.sum(out, axis=2), 1.0, atol=1e-2)

    print("KERNEL_OK")
</pallas_src>

<mosaic_0001>
module attributes {stable_mosaic.version = 11 : i64} {
  func.func @_decoder_tree_kernel(%arg0: i32, %arg1: memref<16x128xbf16, #tpu.memory_space<vmem>>, %arg2: memref<128x256xbf16, #tpu.memory_space<vmem>>, %arg3: memref<1x256xf32, #tpu.memory_space<vmem>>, %arg4: memref<128x128xbf16, #tpu.memory_space<vmem>>, %arg5: memref<1x128xf32, #tpu.memory_space<vmem>>, %arg6: memref<3x16x128xf32, #tpu.memory_space<vmem>>, %arg7: memref<2x16x128xbf16, #tpu.memory_space<vmem>>, %arg8: memref<48x128xbf16, #tpu.memory_space<vmem>>) attributes {dimension_semantics = [#tpu.dimension_semantics<parallel>], iteration_bounds = array<i64: 1>, scalar_prefetch = 0 : i64, scratch_operands = 2 : i64, tpu.core_type = #tpu.core_type<tc>, window_params = [{transform_indices = @transform_0, window_bounds = array<i64: 16, 128>}, {pipeline_mode = #tpu.pipeline_mode<synchronous>, transform_indices = @transform_1, window_bounds = array<i64: 128, 256>}, {pipeline_mode = #tpu.pipeline_mode<synchronous>, transform_indices = @transform_2, window_bounds = array<i64: 1, 256>}, {pipeline_mode = #tpu.pipeline_mode<synchronous>, transform_indices = @transform_3, window_bounds = array<i64: 128, 128>}, {pipeline_mode = #tpu.pipeline_mode<synchronous>, transform_indices = @transform_4, window_bounds = array<i64: 1, 128>}, {transform_indices = @transform_5, window_bounds = array<i64: 3, 16, 128>}]} {
    %c0 = arith.constant 0 : index
    %c0_0 = arith.constant 0 : index
    %0 = vector.load %arg2[%c0, %c0_0] : memref<128x256xbf16, #tpu.memory_space<vmem>>, vector<128x256xbf16>
    %c0_1 = arith.constant 0 : index
    %c0_2 = arith.constant 0 : index
    %1 = vector.load %arg3[%c0_1, %c0_2] : memref<1x256xf32, #tpu.memory_space<vmem>>, vector<1x256xf32>
    %c0_3 = arith.constant 0 : index
    %c0_4 = arith.constant 0 : index
    %2 = vector.load %arg1[%c0_3, %c0_4] : memref<16x128xbf16, #tpu.memory_space<vmem>>, vector<16x128xbf16>
    %cst = arith.constant dense<0.000000e+00> : vector<16x256xf32>
    %3 = tpu.matmul %2, %0, %cst {dimension_numbers = #tpu.dot_dimension_numbers<[1], [0], [0], [1], [0, 0, 1, 1], [], []>} : vector<16x128xbf16>, vector<128x256xbf16>, vector<16x256xf32> -> vector<16x256xf32>
    %4 = vector.broadcast %1 : vector<1x256xf32> to vector<16x256xf32>
    %5 = arith.addf %3, %4 : vector<16x256xf32>
    %6 = math.tanh %5 : vector<16x256xf32>
    %7 = arith.truncf %6 : vector<16x256xf32> to vector<16x256xbf16>
    %8 = vector.extract_strided_slice %7 {offsets = [0, 0], sizes = [16, 128], strides = [1, 1]} : vector<16x256xbf16> to vector<16x128xbf16>
    %9 = vector.extract_strided_slice %7 {offsets = [0, 128], sizes = [16, 128], strides = [1, 1]} : vector<16x256xbf16> to vector<16x128xbf16>
    %c0_5 = arith.constant 0 : index
    %c0_6 = arith.constant 0 : index
    %10 = vector.load %arg8[%c0_5, %c0_6] : memref<48x128xbf16, #tpu.memory_space<vmem>>, vector<16x128xbf16>
    tpu.vector_store %arg8[%c0_5, %c0_6], %8 {strides = array<i32>} : memref<48x128xbf16, #tpu.memory_space<vmem>>, vector<16x128xbf16>,
    %c1 = arith.constant 1 : index
    %c0_7 = arith.constant 0 : index
    %c0_8 = arith.constant 0 : index
    %11 = vector.load %arg7[%c1, %c0_7, %c0_8] : memref<2x16x128xbf16, #tpu.memory_space<vmem>>, vector<1x16x128xbf16>
    %12 = vector.shape_cast %11 : vector<1x16x128xbf16> to vector<16x128xbf16>
    %13 = vector.shape_cast %9 : vector<16x128xbf16> to vector<1x16x128xbf16>
    tpu.vector_store %arg7[%c1, %c0_7, %c0_8], %13 {strides = array<i32>} : memref<2x16x128xbf16, #tpu.memory_space<vmem>>, vector<1x16x128xbf16>,
    %c1_9 = arith.constant 1 : index
    %c0_10 = arith.constant 0 : index
    %c0_11 = arith.constant 0 : index
    %14 = vector.load %arg7[%c1_9, %c0_10, %c0_11] : memref<2x16x128xbf16, #tpu.memory_space<vmem>>, vector<1x16x128xbf16>
    %15 = vector.shape_cast %14 : vector<1x16x128xbf16> to vector<16x128xbf16>
    %cst_12 = arith.constant dense<0.000000e+00> : vector<16x256xf32>
    %16 = tpu.matmul %15, %0, %cst_12 {dimension_numbers = #tpu.dot_dimension_numbers<[1], [0], [0], [1], [0, 0, 1, 1], [], []>} : vector<16x128xbf16>, vector<128x256xbf16>, vector<16x256xf32> -> vector<16x256xf32>
    %17 = vector.broadcast %1 : vector<1x256xf32> to vector<16x256xf32>
    %18 = arith.addf %16, %17 : vector<16x256xf32>
    %19 = math.tanh %18 : vector<16x256xf32>
    %20 = arith.truncf %19 : vector<16x256xf32> to vector<16x256xbf16>
    %21 = vector.extract_strided_slice %20 {offsets = [0, 0], sizes = [16, 128], strides = [1, 1]} : vector<16x256xbf16> to vector<16x128xbf16>
    %22 = vector.extract_strided_slice %20 {offsets = [0, 128], sizes = [16, 128], strides = [1, 1]} : vector<16x256xbf16> to vector<16x128xbf16>
    %c16 = arith.constant 16 : index
    %c0_13 = arith.constant 0 : index
    %23 = vector.load %arg8[%c16, %c0_13] : memref<48x128xbf16, #tpu.memory_space<vmem>>, vector<16x128xbf16>
    tpu.vector_store %arg8[%c16, %c0_13], %21 {strides = array<i32>} : memref<48x128xbf16, #tpu.memory_space<vmem>>, vector<16x128xbf16>,
    %c32 = arith.constant 32 : index
    %c0_14 = arith.constant 0 : index
    %24 = vector.load %arg8[%c32, %c0_14] : memref<48x128xbf16, #tpu.memory_space<vmem>>, vector<16x128xbf16>
    tpu.vector_store %arg8[%c32, %c0_14], %22 {strides = array<i32>} : memref<48x128xbf16, #tpu.memory_space<vmem>>, vector<16x128xbf16>,
    %c0_15 = arith.constant 0 : index
    %c0_16 = arith.constant 0 : index
    %25 = vector.load %arg8[%c0_15, %c0_16] : memref<48x128xbf16, #tpu.memory_space<vmem>>, vector<48x128xbf16>
    %c0_17 = arith.constant 0 : index
    %c0_18 = arith.constant 0 : index
    %26 = vector.load %arg4[%c0_17, %c0_18] : memref<128x128xbf16, #tpu.memory_space<vmem>>, vector<128x128xbf16>
    %cst_19 = arith.constant dense<0.000000e+00> : vector<48x128xf32>
    %27 = tpu.matmul %25, %26, %cst_19 {dimension_numbers = #tpu.dot_dimension_numbers<[1], [0], [0], [1], [0, 0, 1, 1], [], []>} : vector<48x128xbf16>, vector<128x128xbf16>, vector<48x128xf32> -> vector<48x128xf32>
    %c0_20 = arith.constant 0 : index
    %c0_21 = arith.constant 0 : index
    %28 = vector.load %arg5[%c0_20, %c0_21] : memref<1x128xf32, #tpu.memory_space<vmem>>, vector<1x128xf32>
    %29 = vector.broadcast %28 : vector<1x128xf32> to vector<48x128xf32>
    %30 = arith.addf %27, %29 : vector<48x128xf32>
    %cst_22 = arith.constant dense<0xFF800000> : vector<48xf32>
    %31 = vector.multi_reduction <maximumf>, %30, %cst_22 [1] : vector<48x128xf32> to vector<48xf32>
    %32 = vector.shape_cast %31 : vector<48xf32> to vector<48x1xf32>
    %33 = vector.broadcast %32 : vector<48x1xf32> to vector<48x128xf32>
    %34 = arith.subf %30, %33 : vector<48x128xf32>
    %35 = math.exp %34 : vector<48x128xf32>
    %cst_23 = arith.constant dense<0.000000e+00> : vector<48xf32>
    %36 = vector.multi_reduction <add>, %35, %cst_23 [1] : vector<48x128xf32> to vector<48xf32>
    %37 = vector.shape_cast %36 : vector<48xf32> to vector<48x1xf32>
    %38 = tpu.reciprocal %37 {approx = true} : vector<48x1xf32> -> vector<48x1xf32>
    %39 = vector.broadcast %38 : vector<48x1xf32> to vector<48x128xf32>
    %40 = arith.mulf %35, %39 : vector<48x128xf32>
    %41 = vector.shape_cast %40 : vector<48x128xf32> to vector<3x16x128xf32>
    %c0_24 = arith.constant 0 : index
    %c0_25 = arith.constant 0 : index
    %c0_26 = arith.constant 0 : index
    %42 = vector.load %arg6[%c0_24, %c0_25, %c0_26] : memref<3x16x128xf32, #tpu.memory_space<vmem>>, vector<3x16x128xf32>
    tpu.vector_store %arg6[%c0_24, %c0_25, %c0_26], %41 {strides = array<i32>} : memref<3x16x128xf32, #tpu.memory_space<vmem>>, vector<3x16x128xf32>,
    return
  }
  func.func @transform_0(%arg0: i32) -> (i32, i32) {
    %c0_i32 = arith.constant 0 : i32
    %c0_i32_0 = arith.constant 0 : i32
    return %arg0, %c0_i32 : i32, i32
  }
  func.func @transform_1(%arg0: i32) -> (i32, i32) {
    %c0_i32 = arith.constant 0 : i32
    %c0_i32_0 = arith.constant 0 : i32
    %c0_i32_1 = arith.constant 0 : i32
    return %c0_i32, %c0_i32_0 : i32, i32
  }
  func.func @transform_2(%arg0: i32) -> (i32, i32) {
    %c0_i32 = arith.constant 0 : i32
    %c0_i32_0 = arith.constant 0 : i32
    %c0_i32_1 = arith.constant 0 : i32
    return %c0_i32, %c0_i32_0 : i32, i32
  }
  func.func @transform_3(%arg0: i32) -> (i32, i32) {
    %c0_i32 = arith.constant 0 : i32
    %c0_i32_0 = arith.constant 0 : i32
    %c0_i32_1 = arith.constant 0 : i32
    return %c0_i32, %c0_i32_0 : i32, i32
  }
  func.func @transform_4(%arg0: i32) -> (i32, i32) {
    %c0_i32 = arith.constant 0 : i32
    %c0_i32_0 = arith.constant 0 : i32
    %c0_i32_1 = arith.constant 0 : i32
    return %c0_i32, %c0_i32_0 : i32, i32
  }
  func.func @transform_5(%arg0: i32) -> (i32, i32, i32) {
    %c0_i32 = arith.constant 0 : i32
    %c0_i32_0 = arith.constant 0 : i32
    %c0_i32_1 = arith.constant 0 : i32
    return %c0_i32, %arg0, %c0_i32_0 : i32, i32, i32
  }
}

</mosaic_0001>

<bundles_post_ra>
// kernel: tpu_custom_call.1
= control target key start
LH: loop header
LB: loop body
LE: loop exit
PB: predicated region body
PF: predicated region fallthrough
CT: control target
= control target key end

     0   :  { %10 = vsyncpa [#allocation5], 0  ;;  %s912_s0 = inlined_call_operand.hbm [shape: bf16[16,128], index: 0, kind: input, shape index: {}]   ;;  %s913_s1 = inlined_call_operand.hbm [shape: bf16[128,256], index: 1, kind: input, shape index: {}]   ;;  %s914_s2 = inlined_call_operand.vmem [shape: f32[1,256], index: 2, kind: input, shape index: {}]   ;;  %s915_s3 = inlined_call_operand.hbm [shape: bf16[128,128], index: 3, kind: input, shape index: {}]   ;;  %s916_s4 = inlined_call_operand.vmem [shape: f32[1,128], index: 4, kind: input, shape index: {}]   ;;  %s917_s5 = inlined_call_operand.hbm [shape: f32[3,16,128], index: 5, kind: output, shape index: {}]  }
   0x1   :  { %11 = vsyncpa [#allocation8], 0 }
   0x2   :  { %12 = vsyncpa [#allocation6], 0  ;;  %s833_s18 = smov [#allocation7]  }
   0x3   :  { %s30_s19 = sshll.u32 %s833_s18, 4  ;;  %s31_s19 = int_to_ptr.vmem [resolvable:$true] %s30_s19 }
   0x4   :  { %s755_s20 = scalar_lea.vmem %s31_s19, 2048  ;;  %p760_p1 = scmp.lt.s32.totalorder %s31_s19, %s31_s19 }
   0x5   :  { %p756_p0 = scmp.ne.s32.totalorder %s31_s19, %s755_s20  ;;  %p761_p2 = scmp.lt.s32.totalorder %s755_s20, %s755_s20 }
   0x7   :  { %p762_p3 = por %p761_p2, %p760_p1 }
   0x9   :  { %p763_p4 = pnand %p762_p3, %p756_p0 }
   0xb   :  { %766 = shalt.err (!%p763_p4)
}
   0xc   :  { %s834_s21 = smov 128   ;;  %s835_s22 = smov 8  }
   0xd   :  { %36 = dma.hbm_to_vmem [thread:$0]  %s913_s1, 2048, %s31_s19, [#allocation8], %s834_s21, %s834_s21, %s835_s22  }
   0xe   :  { %s836_s25 = smov [#allocation4]  }
   0xf   :  { %s18_s26 = sshll.u32 %s836_s25, 4  ;;  %s19_s26 = int_to_ptr.vmem [resolvable:$true] %s18_s26 }
  0x10   :  { %s775_s27 = scalar_lea.vmem %s19_s26, 128  ;;  %p780_p6 = scmp.lt.s32.totalorder %s19_s26, %s19_s26 }
  0x11   :  { %p776_p5 = scmp.ne.s32.totalorder %s19_s26, %s775_s27  ;;  %p781_p7 = scmp.lt.s32.totalorder %s775_s27, %s775_s27 }
  0x13   :  { %p782_p8 = por %p781_p7, %p780_p6 }
  0x15   :  { %p783_p9 = pnand %p782_p8, %p776_p5 }
  0x17   :  { %786 = shalt.err (!%p783_p9)
}
  0x18   :  { %s837_s28 = smov 64   ;;  %s838_s29 = smov 4  }
  0x19   :  { %24 = dma.hbm_to_vmem [thread:$0]  %s912_s0, 128, %s19_s26, [#allocation5], %s837_s28, %s837_s28, %s838_s29  }
  0x1a   :  { %s839_s7 = smov [#allocation9]  }
  0x1b   :  { %s44_s8 = sshll.u32 %s839_s7, 4  ;;  %s45_s8 = int_to_ptr.vmem [resolvable:$true] %s44_s8 }
  0x1c   :  { %s795_s1 = scalar_lea.vmem %s45_s8, 1024  ;;  %p800_p11 = scmp.lt.s32.totalorder %s45_s8, %s45_s8 }
  0x1d   :  { %p796_p10 = scmp.ne.s32.totalorder %s45_s8, %s795_s1  ;;  %p801_p12 = scmp.lt.s32.totalorder %s795_s1, %s795_s1 }
  0x1f   :  { %p802_p13 = por %p801_p12, %p800_p11 }
  0x21   :  { %p803_p0 = pnand %p802_p13, %p796_p10 }
  0x23   :  { %806 = shalt.err (!%p803_p0)
}
  0x24   :  { %50 = dma.hbm_to_vmem [thread:$0]  %s915_s3, 1024, %s45_s8, [#allocation8], %s837_s28, %s837_s28, %s838_s29  }
  0x25   :  { %827 = dma.done.wait [#allocation5], 128  }
  0x26   :  { %828 = vsyncadd [#allocation5], 4294967168 }
  0x27   :  { %829 = dma.done.wait [#allocation8], 3072  }
  0x28   :  { %830 = vsyncadd [#allocation8], 4294964224  ;;  %v840_v0 = vmov 0   ;;  %v670_v1 = vld [vmem:[#allocation7 + $0x74] ss:$8 sps:$4 sm:$0xff]   ;;  %v841_v19 = vmov 0.0   ;;  %v83_v27 = vlaneseq }
  0x29   :  { %211 = vmatprep.mubr.bf16.mxu1 %v840_v0  ;;  %v672_v2 = vld [vmem:[#allocation7 + $0x70] ss:$8 sps:$4 sm:$0xff]   ;;  %179 = vmatprep.subr.bf16.mxu1 %v670_v1  ;;  %v673_v3 = vld [vmem:[#allocation7 + $0x64] ss:$8 sps:$4 sm:$0xff]   ;;  %v675_v4 = vld [vmem:[#allocation7 + $0x60] ss:$8 sps:$4 sm:$0xff]  }
  0x2a   :  { %180 = vmatpush1.bf16.msra.mxu1 %v672_v2  ;;  %v676_v5 = vld [vmem:[#allocation7 + $0x54] ss:$8 sps:$4 sm:$0xff]   ;;  %v678_v6 = vld [vmem:[#allocation7 + $0x50] ss:$8 sps:$4 sm:$0xff]   ;;  %v679_v7 = vld [vmem:[#allocation7 + $0x44] ss:$8 sps:$4 sm:$0xff]   ;;  %631 = vmatprep.subr.bf16.mxu0 %v841_v19 }
  0x2b   :  { %181 = vmatprep.subr.bf16.mxu1 %v673_v3  ;;  %v681_v8 = vld [vmem:[#allocation7 + $0x40] ss:$8 sps:$4 sm:$0xff]   ;;  %v682_v9 = vld [vmem:[#allocation7 + $0x34] ss:$8 sps:$4 sm:$0xff]   ;;  %v684_v10 = vld [vmem:[#allocation7 + $0x30] ss:$8 sps:$4 sm:$0xff]  }
  0x2c   :  { %v685_v11 = vld [vmem:[#allocation7 + $0x24] ss:$8 sps:$4 sm:$0xff]   ;;  %v687_v12 = vld [vmem:[#allocation7 + $0x20] ss:$8 sps:$4 sm:$0xff]   ;;  %v688_v13 = vld [vmem:[#allocation7 + $0x14] ss:$8 sps:$4 sm:$0xff]  }
  0x2d   :  { %v690_v14 = vld [vmem:[#allocation7 + $0x10] ss:$8 sps:$4 sm:$0xff]   ;;  %v691_v15 = vld [vmem:[#allocation7 + $0x4] ss:$8 sps:$4 sm:$0xff]   ;;  %v693_v16 = vld [vmem:[#allocation7] ss:$8 sps:$4 sm:$0xff]  }
  0x2e   :  { %182 = vmatpush1.bf16.msra.mxu1 %v675_v4  ;;  %v694_v17 = vld [vmem:[#allocation4] sm:$0xff]   ;;  %v696_v20 = vld [vmem:[#allocation9 + $0x30] sm:$0xff]   ;;  %v697_v21 = vld [vmem:[#allocation9 + $0x28] sm:$0xff]   ;;  %vm842_vm0 = vmmov 0   ;;  %v84_v28 = vshrl.u32 %v83_v27, 7 }
  0x2f   :  { %183 = vmatprep.subr.bf16.mxu1 %v676_v5  ;;  %v695_v18 = vld [vmem:[#allocation9 + $0x38] sm:$0xff]   ;;  %v698_v22 = vld [vmem:[#allocation9 + $0x20] sm:$0xff]   ;;  %v700_v24 = vld [vmem:[#allocation9 + $0x10] sm:$0xff]   ;;  %647 = vmatprep.mubr.msk.bf16.mxu0 %vm842_vm0, %v841_v19 }
  0x30   :  { %632 = vmatpush3.bf16.msra.mxu0 %v695_v18  ;;  %v699_v23 = vld [vmem:[#allocation9 + $0x18] sm:$0xff]   ;;  %v701_v25 = vld [vmem:[#allocation9 + $0x8] sm:$0xff]   ;;  %v702_v26 = vld [vmem:[#allocation9] sm:$0xff]   ;;  %v85_v29 = vsub.s32 0, %v84_v28  ;;  %v89_v31 = vsub.s32 1, %v84_v28 }
  0x31   :  { %633 = vmatprep.subr.bf16.mxu0 %v841_v19  ;;  %v79_v30 = vld [vmem:[%s914_s2] sm:$0x3] }
  0x32   :  { %184 = vmatpush1.bf16.msra.mxu1 %v678_v6  ;;  %v86_v32 = vrot.slane %v79_v30, %v85_v29  ;;  %v90_v34 = vrot.slane %v79_v30, %v89_v31  ;;  %v578_v50 = vld [vmem:[%s916_s4] ss:$0 sm:$0xff]  ;;  %s843_s4 = smov [#allocation10]  }
  0x33   :  { %185 = vmatprep.subr.bf16.mxu1 %v679_v7  ;;  %s539_s12 = sshll.u32 %s843_s4, 4  ;;  %s540_s12 = int_to_ptr.vmem [resolvable:$true] %s539_s12 }
  0x34   :  { %634 = vmatpush3.bf16.msra.mxu0 %v696_v20  ;;  %s807_s13 = scalar_lea.vmem %s540_s12, 768  ;;  %p812_p2 = scmp.lt.s32.totalorder %s540_s12, %s540_s12 }
  0x35   :  { %635 = vmatprep.subr.bf16.mxu0 %v841_v19  ;;  %p808_p1 = scmp.ne.s32.totalorder %s540_s12, %s807_s13  ;;  %p813_p3 = scmp.lt.s32.totalorder %s807_s13, %s807_s13 }
  0x36   :  { %186 = vmatpush1.bf16.msra.mxu1 %v681_v8 }
  0x37   :  { %187 = vmatprep.subr.bf16.mxu1 %v682_v9  ;;  %p814_p4 = por %p813_p3, %p812_p2 }
  0x38   :  { %636 = vmatpush3.bf16.msra.mxu0 %v697_v21 }
  0x39   :  { %637 = vmatprep.subr.bf16.mxu0 %v841_v19  ;;  %p815_p5 = pnand %p814_p4, %p808_p1 }
  0x3a   :  { %188 = vmatpush1.bf16.msra.mxu1 %v684_v10 }
  0x3b   :  { %189 = vmatprep.subr.bf16.mxu1 %v685_v11 }
  0x3c   :  { %638 = vmatpush3.bf16.msra.mxu0 %v698_v22 }
  0x3d   :  { %639 = vmatprep.subr.bf16.mxu0 %v841_v19 }
  0x3e   :  { %190 = vmatpush1.bf16.msra.mxu1 %v687_v12 }
  0x3f   :  { %191 = vmatprep.subr.bf16.mxu1 %v688_v13 }
  0x40   :  { %640 = vmatpush3.bf16.msra.mxu0 %v699_v23 }
  0x41   :  { %641 = vmatprep.subr.bf16.mxu0 %v841_v19 }
  0x42   :  { %192 = vmatpush1.bf16.msra.mxu1 %v690_v14 }
  0x43   :  { %193 = vmatprep.subr.bf16.mxu1 %v691_v15 }
  0x44   :  { %642 = vmatpush3.bf16.msra.mxu0 %v700_v24 }
  0x45   :  { %643 = vmatprep.subr.bf16.mxu0 %v841_v19 }
  0x46   :  { %194 = vmatpush1.bf16.msra.mxu1 %v693_v16 }
  0x47   :  { %255 = vmatprep.subr.bf16.mxu1 %v670_v1 }
  0x48   :  { %644 = vmatpush3.bf16.msra.mxu0 %v701_v25 }
  0x49   :  { %212 = vmatmul.mubr.bf16.vlgmr.msra.gmra.mxu1 %v694_v17  ;;  %645 = vmatprep.subr.bf16.mxu0 %v841_v19 }
  0x4a   :  { %256 = vmatpush1.bf16.msra.mxu1 %v672_v2  ;;  %287 = vmatprep.mubr.bf16.mxu1 %v840_v0 }
  0x4b   :  { %257 = vmatprep.subr.bf16.mxu1 %v673_v3 }
  0x4c   :  { %646 = vmatpush3.bf16.msra.mxu0 %v702_v26 }
  0x4e   :  { %258 = vmatpush1.bf16.msra.mxu1 %v675_v4 }
  0x4f   :  { %259 = vmatprep.subr.bf16.mxu1 %v676_v5 }
  0x52   :  { %260 = vmatpush1.bf16.msra.mxu1 %v678_v6 }
  0x53   :  { %261 = vmatprep.subr.bf16.mxu1 %v679_v7 }
  0x56   :  { %262 = vmatpush1.bf16.msra.mxu1 %v681_v8 }
  0x57   :  { %263 = vmatprep.subr.bf16.mxu1 %v682_v9 }
  0x5a   :  { %264 = vmatpush1.bf16.msra.mxu1 %v684_v10 }
  0x5b   :  { %265 = vmatprep.subr.bf16.mxu1 %v685_v11 }
  0x5e   :  { %266 = vmatpush1.bf16.msra.mxu1 %v687_v12 }
  0x5f   :  { %267 = vmatprep.subr.bf16.mxu1 %v688_v13 }
  0x62   :  { %268 = vmatpush1.bf16.msra.mxu1 %v690_v14 }
  0x63   :  { %269 = vmatprep.subr.bf16.mxu1 %v691_v15 }
  0x66   :  { %270 = vmatpush1.bf16.msra.mxu1 %v693_v16 }
 0x109   :  { %v213_v33 = vpop.f32.mrf.mxu1 }
 0x10a   :  { %v214_v35 = vadd.f32 %v213_v33, %v86_v32 }
 0x10b   :  { %v215_v36 = vpop.f32.mrf.mxu1 }
 0x10c   :  { %v216_v37 = vadd.f32 %v215_v36, %v90_v34  ;;  %707 = vtanh.f32 %v214_v35 }
 0x10d   :  { %v217_v38 = vpop.f32.mrf.mxu1 }
 0x10e   :  { %v218_v39 = vadd.f32 %v217_v38, %v86_v32 }
 0x10f   :  { %v219_v40 = vpop.f32.mrf.mxu1 }
 0x110   :  { %709 = vtanh.f32 %v218_v39  ;;  %v220_v41 = vadd.f32 %v219_v40, %v90_v34 }
 0x111   :  { %711 = vtanh.f32 %v216_v37 }
 0x112   :  { %713 = vtanh.f32 %v220_v41 }
 0x119   :  { %v708_v42 = vpop.eup %707 }
 0x11d   :  { %v710_v43 = vpop.eup %709 }
 0x11e   :  { %v712_v44 = vpop.eup %711  ;;  %v601_v45 = vpack.c.bf16 %v710_v43, %v708_v42 }
 0x11f   :  { %v714_v46 = vpop.eup %713 }
 0x120   :  { %602 = vst [vmem:[#allocation3] sm:$0xff] %v601_v45   ;;  %v606_v47 = vpack.c.bf16 %v714_v46, %v712_v44 }
 0x122   :  { %607 = vst [vmem:[#allocation2 + $0x8] sm:$0xff] %v606_v47  }
 0x127   :  { %v703_v48 = vld [vmem:[#allocation3] sm:$0xff]  }
 0x128   :  { %648 = vmatmul.mubr.bf16.vlgmr.msra.gmra.mxu0 %v703_v48 }
 0x129   :  { %v704_v49 = vld [vmem:[#allocation2 + $0x8] sm:$0xff]   ;;  %651 = vmatprep.mubr.msk.bf16.mxu0 %vm842_vm0, %v841_v19 }
 0x12a   :  { %288 = vmatmul.mubr.bf16.vlgmr.msra.gmra.mxu1 %v704_v49 }
 0x1e8   :  { %v451_v51 = vpop.f32.mrf.mxu0 }
 0x1e9   :  { %v452_v52 = vadd.f32 %v578_v50, %v451_v51 }
 0x1ea   :  { %v289_v53 = vpop.f32.mrf.mxu1  ;;  %v649_v54 = vpop.f32.mrf.mxu0 }
 0x1eb   :  { %474 = vmax.xlane.f32.xlu0 %v452_v52  ;;  %v290_v55 = vadd.f32 %v289_v53, %v86_v32 }
 0x1ec   :  { %v291_v56 = vpop.f32.mrf.mxu1  ;;  %v454_v57 = vpop.f32.mrf.mxu0 }
 0x1ed   :  { %v455_v58 = vadd.f32 %v578_v50, %v454_v57  ;;  %v292_v59 = vadd.f32 %v291_v56, %v90_v34  ;;  %715 = vtanh.f32 %v290_v55 }
 0x1ee   :  { %v293_v60 = vpop.f32.mrf.mxu1  ;;  %v650_v61 = vpop.f32.mrf.mxu0 }
 0x1ef   :  { %v294_v62 = vadd.f32 %v293_v60, %v86_v32  ;;  %476 = vmax.xlane.f32.xlu0 %v455_v58 }
 0x1f0   :  { %v295_v63 = vpop.f32.mrf.mxu1 }
 0x1f1   :  { %717 = vtanh.f32 %v294_v62  ;;  %v296_v0 = vadd.f32 %v295_v63, %v90_v34 }
 0x1f2   :  { %719 = vtanh.f32 %v292_v59 }
 0x1f3   :  { %721 = vtanh.f32 %v296_v0 }
 0x1fa   :  { %v716_v1 = vpop.eup %715 }
 0x1fe   :  { %v718_v2 = vpop.eup %717 }
 0x1ff   :  { %v720_v3 = vpop.eup %719  ;;  %v611_v4 = vpack.c.bf16 %v718_v2, %v716_v1 }
 0x200   :  { %v722_v5 = vpop.eup %721 }
 0x201   :  { %618 = vst [vmem:[#allocation3 + $0x8] sm:$0xff] %v611_v4   ;;  %v616_v6 = vpack.c.bf16 %v722_v5, %v720_v3 }
 0x203   :  { %619 = vst [vmem:[#allocation3 + $0x10] sm:$0xff] %v616_v6  }
 0x208   :  { %v705_v7 = vld [vmem:[#allocation3 + $0x8] sm:$0xff]  }
 0x209   :  { %652 = vmatmul.mubr.bf16.gmra.mxu0 %v705_v7 }
 0x20a   :  { %655 = vmatprep.mubr.msk.bf16.mxu0 %vm842_vm0, %v841_v19  ;;  %v706_v8 = vld [vmem:[#allocation3 + $0x10] sm:$0xff]  }
 0x211   :  { %656 = vmatmul.mubr.bf16.gmra.mxu0 %v706_v8 }
 0x274   :  { %v475_v9 = vpop.xlane.xlu0 %474 }
 0x275   :  { %v486_v10 = vsub.f32 %v452_v52, %v475_v9 }
 0x277   :  { %v492_v12 = vmul.f32 1.442695, %v486_v10 }
 0x278   :  { %v477_v11 = vpop.xlane.xlu0 %476 }
 0x279   :  { %v487_v13 = vsub.f32 %v455_v58, %v477_v11  ;;  %723 = vpow2.f32 %v492_v12 }
 0x27b   :  { %v494_v15 = vmul.f32 1.442695, %v487_v13 }
 0x27d   :  { %725 = vpow2.f32 %v494_v15 }
 0x286   :  { %v724_v26 = vpop.eup %723 }
 0x28a   :  { %v726_v28 = vpop.eup %725 }
 0x2c9   :  { %v459_v14 = vpop.f32.mrf.mxu0 }
 0x2ca   :  { %v460_v16 = vadd.f32 %v578_v50, %v459_v14 }
 0x2cb   :  { %v653_v17 = vpop.f32.mrf.mxu0 }
 0x2cc   :  { %478 = vmax.xlane.f32.xlu1 %v460_v16 }
 0x2cd   :  { %v462_v18 = vpop.f32.mrf.mxu0 }
 0x2ce   :  { %v463_v20 = vadd.f32 %v578_v50, %v462_v18 }
 0x2cf   :  { %v654_v21 = vpop.f32.mrf.mxu0 }
 0x2d0   :  { %480 = vmax.xlane.f32.xlu1 %v463_v20 }
 0x2d1   :  { %v467_v22 = vpop.f32.mrf.mxu0 }
 0x2d2   :  { %v468_v19 = vadd.f32 %v578_v50, %v467_v22 }
 0x2d3   :  { %v657_v23 = vpop.f32.mrf.mxu0 }
 0x2d4   :  { %482 = vmax.xlane.f32.xlu0 %v468_v19 }
 0x2d5   :  { %v470_v24 = vpop.f32.mrf.mxu0 }
 0x2d6   :  { %v471_v25 = vadd.f32 %v578_v50, %v470_v24 }
 0x2d7   :  { %v658_v27 = vpop.f32.mrf.mxu0 }
 0x2d8   :  { %504 = vadd.xlane.f32.xlu0 %v724_v26  ;;  %484 = vmax.xlane.f32.xlu1 %v471_v25 }
 0x2dc   :  { %506 = vadd.xlane.f32.xlu1 %v726_v28 }
 0x355   :  { %v479_v29 = vpop.xlane.xlu1 %478 }
 0x356   :  { %v488_v30 = vsub.f32 %v460_v16, %v479_v29 }
 0x358   :  { %v496_v31 = vmul.f32 1.442695, %v488_v30 }
 0x359   :  { %v481_v32 = vpop.xlane.xlu1 %480 }
 0x35a   :  { %727 = vpow2.f32 %v496_v31  ;;  %v489_v33 = vsub.f32 %v463_v20, %v481_v32 }
 0x35c   :  { %v498_v34 = vmul.f32 1.442695, %v489_v33 }
 0x35d   :  { %v483_v35 = vpop.xlane.xlu0 %482 }
 0x35e   :  { %729 = vpow2.f32 %v498_v34  ;;  %v490_v36 = vsub.f32 %v468_v19, %v483_v35 }
 0x360   :  { %v500_v37 = vmul.f32 1.442695, %v490_v36 }
 0x361   :  { %v505_v38 = vpop.xlane.xlu0 %504  ;;  %v485_v39 = vpop.xlane.xlu1 %484 }
 0x362   :  { %731 = vpow2.f32 %v500_v37  ;;  %v491_v40 = vsub.f32 %v471_v25, %v485_v39 }
 0x363   :  { %733 = vrcp.f32 %v505_v38 }
 0x364   :  { %v502_v41 = vmul.f32 1.442695, %v491_v40 }
 0x365   :  { %v507_v42 = vpop.xlane.xlu1 %506 }
 0x366   :  { %735 = vpow2.f32 %v502_v41 }
 0x367   :  { %v728_v43 = vpop.eup %727  ;;  %737 = vrcp.f32 %v507_v42 }
 0x368   :  { %508 = vadd.xlane.f32.xlu0 %v728_v43 }
 0x36b   :  { %v730_v44 = vpop.eup %729 }
 0x36c   :  { %510 = vadd.xlane.f32.xlu1 %v730_v44 }
 0x36f   :  { %v732_v45 = vpop.eup %731 }
 0x370   :  { %v734_v46 = vpop.eup %733  ;;  %512 = vadd.xlane.f32.xlu0 %v732_v45 }
 0x371   :  { %v522_v47 = vmul.f32 %v734_v46, %v724_v26 }
 0x373   :  { %v736_v48 = vpop.eup %735  ;;  %528 = vst [vmem:[#allocation10] sm:$0xff] %v522_v47 }
 0x374   :  { %v738_v49 = vpop.eup %737  ;;  %514 = vadd.xlane.f32.xlu1 %v736_v48 }
 0x375   :  { %v523_v50 = vmul.f32 %v738_v49, %v726_v28 }
 0x377   :  { %529 = vst [vmem:[#allocation10 + $0x8] sm:$0xff] %v523_v50 }
 0x3f1   :  { %v509_v51 = vpop.xlane.xlu0 %508 }
 0x3f2   :  { %739 = vrcp.f32 %v509_v51 }
 0x3f5   :  { %v511_v52 = vpop.xlane.xlu1 %510 }
 0x3f6   :  { %741 = vrcp.f32 %v511_v52 }
 0x3f9   :  { %v513_v53 = vpop.xlane.xlu0 %512 }
 0x3fa   :  { %743 = vrcp.f32 %v513_v53 }
 0x3fd   :  { %v515_v54 = vpop.xlane.xlu1 %514 }
 0x3fe   :  { %745 = vrcp.f32 %v515_v54 }
 0x3ff   :  { %v740_v55 = vpop.eup %739 }
 0x400   :  { %v524_v56 = vmul.f32 %v740_v55, %v728_v43 }
 0x402   :  { %530 = vst [vmem:[#allocation10 + $0x10] sm:$0xff] %v524_v56 }
 0x403   :  { %v742_v57 = vpop.eup %741 }
 0x404   :  { %v525_v58 = vmul.f32 %v742_v57, %v730_v44 }
 0x406   :  { %531 = vst [vmem:[#allocation10 + $0x18] sm:$0xff] %v525_v58 }
 0x407   :  { %v744_v59 = vpop.eup %743 }
 0x408   :  { %v526_v60 = vmul.f32 %v744_v59, %v732_v45 }
 0x40a   :  { %532 = vst [vmem:[#allocation10 + $0x20] sm:$0xff] %v526_v60 }
 0x40b   :  { %v746_v61 = vpop.eup %745 }
 0x40c   :  { %v527_v62 = vmul.f32 %v746_v61, %v736_v48 }
 0x40e   :  { %533 = vst [vmem:[#allocation10 + $0x28] sm:$0xff] %v527_v62 }
 0x40f   :  { %818 = shalt.err (!%p815_p5)
}
 0x410   :  { %545 = dma.vmem_to_hbm [thread:$0]  %s540_s12, 768, %s917_s5, [#allocation6], %s834_s21, %s834_s21, %s835_s22  }
 0x411   :  { %831 = dma.done.wait [#allocation6], 768  }
 0x412   :  { %832 = vsyncadd [#allocation6], 4294966528 }
 0x413   :  { %549 = vsyncpa [#allocation5], 1 }
 0x414   :  { %550 = vsyncpa [#allocation8], 1 }
 0x415   :  { %551 = vsyncpa [#allocation6], 1 }

</bundles_post_ra>
